<compile_context>
chip_gen: v5e
topology: v5e:2x2
jax: 0.10.0
libtpu: 0.0.40
codegen_flags: <defaults>
</compile_context>

<pallas_src>
import functools

import jax
import jax.numpy as jnp
from jax import lax
from jax.experimental import pallas as pl
from jax.experimental.pallas import tpu as pltpu

LANES = 128
SUBLANES = 8
CHUNK_ROWS = 256            # rows per inner-loop chunk (256x128 f32 = 128 KiB)


def _round_up(x, m):
    return ((x + m - 1) // m) * m


def _generation_defaults():
    """Returns (streaming-block rows, vmem_limit_bytes) per TPU generation."""
    try:
        kind = jax.devices()[0].device_kind.lower()
    except Exception:   # defensive: keeps the wrapper traceable anywhere
        kind = ""
    if "v7" in kind or "7x" in kind:
        # ~3.2 TB/s HBM per TC but only 64 MiB VMEM: big tiles, explicit limit.
        return 8192, 48 << 20
    if "v6" in kind:
        return 4096, 64 << 20
    if "v5" in kind:
        # v5e scoped default is only 16 MiB; 1-2 MiB tiles already amortize the
        # per-step overhead at ~820 GB/s, so keep tiles modest.
        return 2048, 32 << 20
    return 2048, 32 << 20


def _soft_dice_partials_kernel(x_ref, t_ref, out_ref, *, n_valid,
                               rows_per_block, chunk_rows, approx):
    """Accumulates per-(sublane, lane) partial sums into a resident out block.

    x_ref, t_ref : (rows_per_block, 128) VMEM tiles in the inputs' native dtype
    out_ref      : (1, 3, 8, 128) f32 block, resident across the "arbitrary"
                   grid axis. [0]=sum(sigmoid(x)*t), [1]=sum(sigmoid(x)), [2]=sum(t).
    """
    block_elems = rows_per_block * LANES
    num_chunks = rows_per_block // chunk_rows

    # Global block index and the flat element offset of this block's start.
    g = pl.program_id(0) * pl.num_programs(1) + pl.program_id(1)
    base = g * block_elems

    @pl.when(pl.program_id(1) == 0)
    def _init():
        out_ref[...] = jnp.zeros_like(out_ref)

    def sigmoid(x):
        if approx:
            # exp on the EUP, approximate reciprocal also on the EUP: keeps the
            # per-element work off the 4 VALU slots (matters for bf16/int8 on v7x).
            return pl.reciprocal(1.0 + jnp.exp(-x), approx=True)
        return jax.nn.sigmoid(x)

    def fold(v):
        # (chunk_rows, 128) -> (8, 128): row-groups of 8 fold onto the sublane
        # axis (layout no-op), so this reduction is pure VPU vreg adds.
        return jnp.sum(v.reshape(-1, SUBLANES, LANES), axis=0)

    def accumulate(masked):
        if masked:
            local = (lax.broadcasted_iota(jnp.int32, (chunk_rows, LANES), 0) * LANES
                     + lax.broadcasted_iota(jnp.int32, (chunk_rows, LANES), 1))

        def body(c, carry):
            acc_pt, acc_p, acc_t = carry
            r0 = c * chunk_rows
            x = x_ref[pl.ds(r0, chunk_rows), :].astype(jnp.float32)
            t = t_ref[pl.ds(r0, chunk_rows), :].astype(jnp.float32)
            p = sigmoid(x)
            if masked:
                # Zero every lane whose flat element index is >= n_valid. This
                # covers the ragged tail, the lane-alignment pad AND garbage in
                # partial / overflow blocks (OOB block contents are undefined).
                valid = (base + r0 * LANES + local) < n_valid
                p = jnp.where(valid, p, 0.0)
                t = jnp.where(valid, t, 0.0)
            return acc_pt + fold(p * t), acc_p + fold(p), acc_t + fold(t)

        zero = jnp.zeros((SUBLANES, LANES), jnp.float32)
        s_pt, s_p, s_t = lax.fori_loop(0, num_chunks, body, (zero, zero, zero),
                                       unroll=True)
        out_ref[0, 0] += s_pt
        out_ref[0, 1] += s_p
        out_ref[0, 2] += s_t

    needs_mask = base + block_elems > n_valid

    @pl.when(jnp.logical_not(needs_mask))
    def _interior():
        accumulate(masked=False)

    @pl.when(needs_mask)
    def _boundary():
        accumulate(masked=True)


@functools.partial(jax.jit, static_argnames=("approx_sigmoid", "block_rows"))
def soft_dice_loss(logits, targets, approx_sigmoid=True, block_rows=None):
    """Pallas equivalent of SoftDiceLoss.forward(logits, targets).

    approx_sigmoid: use the EUP approximate reciprocal for 1/(1+exp(-x)).
    block_rows:     optional override of the streaming block height in rows of
                    128 lanes (multiple of 8); mainly for tests.
    """
    xf = logits.reshape(-1)            # native dtype; reshape is free
    tf = targets.reshape(-1)
    n = xf.shape[0]

    # Lane-align the flat length so a 2-D (rows, 128) lane-dense view exists.
    # The (<=127 element) tail is masked in-kernel, so nothing is ever padded
    # to a block multiple and the fill value is never relied upon.
    n128 = _round_up(n, LANES)
    if n128 != n:
        # TODO(synk): a 1-D BlockSpec would avoid even this small pad copy.
        xf = jnp.pad(xf, (0, n128 - n))
        tf = jnp.pad(tf, (0, n128 - n))
    rows = n128 // LANES
    x2 = xf.reshape(rows, LANES)
    t2 = tf.reshape(rows, LANES)

    gen_rows, vmem_limit = _generation_defaults()
    if block_rows is not None:
        gen_rows = int(block_rows)
    # 32-row granularity keeps the block legal for f32/bf16/int8 sublane tiling.
    rows_per_block = min(gen_rows, _round_up(rows, 32))
    chunk_rows = min(CHUNK_ROWS, rows_per_block)
    rows_per_block = _round_up(rows_per_block, chunk_rows)

    total_blocks = pl.cdiv(rows, rows_per_block)
    num_shards = 2 if total_blocks >= 2 else 1       # keep both v7x TCs busy
    blocks_per_shard = pl.cdiv(total_blocks, num_shards)

    def in_map(s, b):
        # Clamp overflow iterations of the last shard onto the final block;
        # their contribution is fully masked out inside the kernel.
        return (jnp.minimum(s * blocks_per_shard + b, total_blocks - 1), 0)

    in_spec = pl.BlockSpec((rows_per_block, LANES), in_map)
    out_spec = pl.BlockSpec((1, 3, SUBLANES, LANES), lambda s, b: (s, 0, 0, 0))

    kernel = functools.partial(
        _soft_dice_partials_kernel, n_valid=n, rows_per_block=rows_per_block,
        chunk_rows=chunk_rows, approx=approx_sigmoid)

    bytes_accessed = (x2.size * x2.dtype.itemsize + t2.size * t2.dtype.itemsize
                      + num_shards * 3 * SUBLANES * LANES * 4)
    partials = pl.pallas_call(
        kernel,
        out_shape=jax.ShapeDtypeStruct((num_shards, 3, SUBLANES, LANES),
                                       jnp.float32),
        grid=(num_shards, blocks_per_shard),
        in_specs=[in_spec, in_spec],
        out_specs=out_spec,
        compiler_params=pltpu.CompilerParams(
            dimension_semantics=("parallel", "arbitrary"),
            vmem_limit_bytes=vmem_limit),
        cost_estimate=pl.CostEstimate(
            flops=6 * n, transcendentals=n, bytes_accessed=bytes_accessed),
    )(x2, t2)

    # Tiny finalize: fold shards + (sublane, lane) partials, then the dice ratio.
    sums = jnp.sum(partials, axis=(0, 2, 3))          # (3,) f32
    intersection, sum_p, sum_t = sums[0], sums[1], sums[2]
    smooth = jnp.float32(1.0)
    return jnp.float32(1.0) - (2.0 * intersection + smooth) / (sum_p + sum_t + smooth)


def soft_dice_loss_ref(logits, targets):
    """Pure-JAX reference mirroring the PyTorch module."""
    smooth = 1.0
    iflat = jax.nn.sigmoid(logits.astype(jnp.float32)).reshape(-1)
    tflat = targets.astype(jnp.float32).reshape(-1)
    intersection = jnp.sum(iflat * tflat)
    return 1.0 - (2.0 * intersection + smooth) / (jnp.sum(iflat) + jnp.sum(tflat) + smooth)


if __name__ == "__main__":
    key = jax.random.PRNGKey(0)
    k1, k2, k3, k4, k5, k6, k7, k8 = jax.random.split(key, 8)

    # 1) Block-aligned NCHW f32 inputs. Exact sigmoid -> tight tolerance.
    logits = jax.random.normal(k1, (2, 4, 16, 16), dtype=jnp.float32)
    targets = (jax.random.uniform(k2, (2, 4, 16, 16)) > 0.5).astype(jnp.float32)
    ref = soft_dice_loss_ref(logits, targets)
    out = jax.block_until_ready(
        soft_dice_loss(logits, targets, approx_sigmoid=False))
    assert jnp.allclose(out, ref, atol=1e-5, rtol=1e-5), (out, ref)

    # Default path: approximate EUP reciprocal (slightly looser tolerance).
    out_a = jax.block_until_ready(soft_dice_loss(logits, targets))
    assert jnp.allclose(out_a, ref, atol=2e-3, rtol=2e-3), (out_a, ref)

    # 2) Unaligned flat size (600 elems): exercises the in-kernel ragged mask.
    logits2 = jax.random.normal(k3, (2, 3, 10, 10), dtype=jnp.float32)
    targets2 = (jax.random.uniform(k4, (2, 3, 10, 10)) > 0.5).astype(jnp.float32)
    ref2 = soft_dice_loss_ref(logits2, targets2)
    out2 = jax.block_until_ready(
        soft_dice_loss(logits2, targets2, approx_sigmoid=False))
    assert jnp.allclose(out2, ref2, atol=1e-5, rtol=1e-5), (out2, ref2)

    # 3) Narrow native dtypes (bf16 logits, int8 targets): less HBM traffic.
    logits3 = jax.random.normal(k5, (2, 4, 16, 16), dtype=jnp.bfloat16)
    targets3 = (jax.random.uniform(k6, (2, 4, 16, 16)) > 0.5).astype(jnp.int8)
    ref3 = soft_dice_loss_ref(logits3, targets3)
    out3 = jax.block_until_ready(
        soft_dice_loss(logits3, targets3, approx_sigmoid=False))
    assert jnp.allclose(out3, ref3, atol=1e-5, rtol=1e-5), (out3, ref3)

    # 4) Small block override: multi-block grid, 2-shard split, one clamped
    #    overflow block and a partial last block (accumulator + mask paths).
    logits4 = jax.random.normal(k7, (2, 3, 24, 16), dtype=jnp.float32)
    targets4 = (jax.random.uniform(k8, (2, 3, 24, 16)) > 0.5).astype(jnp.float32)
    ref4 = soft_dice_loss_ref(logits4, targets4)
    out4 = jax.block_until_ready(
        soft_dice_loss(logits4, targets4, approx_sigmoid=False, block_rows=8))
    assert jnp.allclose(out4, ref4, atol=1e-5, rtol=1e-5), (out4, ref4)

    print("KERNEL_OK")
</pallas_src>

<mosaic_0001>
module attributes {stable_mosaic.version = 11 : i64} {
  func.func @_soft_dice_partials_kernel(%arg0: i32, %arg1: i32, %arg2: memref<32x128xf32, #tpu.memory_space<vmem>>, %arg3: memref<32x128xf32, #tpu.memory_space<vmem>>, %arg4: memref<1x3x8x128xf32, #tpu.memory_space<vmem>>) attributes {dimension_semantics = [#tpu.dimension_semantics<parallel>, #tpu.dimension_semantics<arbitrary>], iteration_bounds = array<i64: 1, 1>, scalar_prefetch = 0 : i64, scratch_operands = 0 : i64, tpu.core_type = #tpu.core_type<tc>, window_params = [{transform_indices = @transform_0, window_bounds = array<i64: 32, 128>}, {transform_indices = @transform_1, window_bounds = array<i64: 32, 128>}, {transform_indices = @transform_2, window_bounds = array<i64: 1, 3, 8, 128>}]} {
    %c1_i32 = arith.constant 1 : i32
    %0 = arith.muli %arg0, %c1_i32 : i32
    %1 = arith.addi %0, %arg1 : i32
    %c4096_i32 = arith.constant 4096 : i32
    %2 = arith.muli %1, %c4096_i32 : i32
    %c0_i32 = arith.constant 0 : i32
    %3 = arith.cmpi eq, %arg1, %c0_i32 : i32
    %4 = arith.extui %3 : i1 to i32
    %c0_i32_0 = arith.constant 0 : i32
    %5 = arith.cmpi ne, %4, %c0_i32_0 : i32
    scf.if %5 {
      %cst = arith.constant 0.000000e+00 : f32
      %13 = vector.broadcast %cst : f32 to vector<1x3x8x128xf32>
      %c0 = arith.constant 0 : index
      %c0_4 = arith.constant 0 : index
      %c0_5 = arith.constant 0 : index
      %c0_6 = arith.constant 0 : index
      %14 = vector.load %arg4[%c0, %c0_4, %c0_5, %c0_6] : memref<1x3x8x128xf32, #tpu.memory_space<vmem>>, vector<1x3x8x128xf32>
      tpu.vector_store %arg4[%c0, %c0_4, %c0_5, %c0_6], %13 {strides = array<i32>} : memref<1x3x8x128xf32, #tpu.memory_space<vmem>>, vector<1x3x8x128xf32>,
    } else {
    }
    %c4096_i32_1 = arith.constant 4096 : i32
    %6 = arith.addi %2, %c4096_i32_1 : i32
    %c2048_i32 = arith.constant 2048 : i32
    %7 = arith.cmpi sgt, %6, %c2048_i32 : i32
    %true = arith.constant true
    %8 = arith.xori %7, %true : i1
    %9 = arith.extui %8 : i1 to i32
    %c0_i32_2 = arith.constant 0 : i32
    %10 = arith.cmpi ne, %9, %c0_i32_2 : i32
    scf.if %10 {
      %cst = arith.constant 0.000000e+00 : f32
      %13 = vector.broadcast %cst : f32 to vector<8x128xf32>
      %c0_i32_4 = arith.constant 0 : i32
      %c32_i32 = arith.constant 32 : i32
      %14 = arith.muli %c0_i32_4, %c32_i32 : i32
      %15 = arith.index_cast %14 : i32 to index
      %c0 = arith.constant 0 : index
      %16 = vector.load %arg2[%15, %c0] : memref<32x128xf32, #tpu.memory_space<vmem>>, vector<32x128xf32>
      %17 = arith.index_cast %14 : i32 to index
      %c0_5 = arith.constant 0 : index
      %18 = vector.load %arg3[%17, %c0_5] : memref<32x128xf32, #tpu.memory_space<vmem>>, vector<32x128xf32>
      %19 = arith.negf %16 : vector<32x128xf32>
      %20 = math.exp %19 : vector<32x128xf32>
      %cst_6 = arith.constant 1.000000e+00 : f32
      %21 = vector.broadcast %cst_6 : f32 to vector<32x128xf32>
      %22 = arith.addf %21, %20 : vector<32x128xf32>
      %23 = arith.divf %21, %22 : vector<32x128xf32>
      %24 = arith.mulf %23, %18 : vector<32x128xf32>
      %25 = vector.shape_cast %24 : vector<32x128xf32> to vector<4x8x128xf32>
      %cst_7 = arith.constant dense<0.000000e+00> : vector<8x128xf32>
      %26 = vector.multi_reduction <add>, %25, %cst_7 [0] : vector<4x8x128xf32> to vector<8x128xf32>
      %27 = arith.addf %13, %26 : vector<8x128xf32>
      %28 = vector.shape_cast %23 : vector<32x128xf32> to vector<4x8x128xf32>
      %cst_8 = arith.constant dense<0.000000e+00> : vector<8x128xf32>
      %29 = vector.multi_reduction <add>, %28, %cst_8 [0] : vector<4x8x128xf32> to vector<8x128xf32>
      %30 = arith.addf %13, %29 : vector<8x128xf32>
      %31 = vector.shape_cast %18 : vector<32x128xf32> to vector<4x8x128xf32>
      %cst_9 = arith.constant dense<0.000000e+00> : vector<8x128xf32>
      %32 = vector.multi_reduction <add>, %31, %cst_9 [0] : vector<4x8x128xf32> to vector<8x128xf32>
      %33 = arith.addf %13, %32 : vector<8x128xf32>
      %c1_i32_10 = arith.constant 1 : i32
      %c0_11 = arith.constant 0 : index
      %c0_12 = arith.constant 0 : index
      %c0_13 = arith.constant 0 : index
      %c0_14 = arith.constant 0 : index
      %34 = vector.load %arg4[%c0_11, %c0_12, %c0_13, %c0_14] : memref<1x3x8x128xf32, #tpu.memory_space<vmem>>, vector<1x1x8x128xf32>
      %35 = vector.shape_cast %34 : vector<1x1x8x128xf32> to vector<8x128xf32>
      %36 = arith.addf %35, %27 : vector<8x128xf32>
      %c0_15 = arith.constant 0 : index
      %c0_16 = arith.constant 0 : index
      %c0_17 = arith.constant 0 : index
      %c0_18 = arith.constant 0 : index
      %37 = vector.load %arg4[%c0_15, %c0_16, %c0_17, %c0_18] : memref<1x3x8x128xf32, #tpu.memory_space<vmem>>, vector<1x1x8x128xf32>
      %38 = vector.shape_cast %37 : vector<1x1x8x128xf32> to vector<8x128xf32>
      %39 = vector.shape_cast %36 : vector<8x128xf32> to vector<1x1x8x128xf32>
      tpu.vector_store %arg4[%c0_15, %c0_16, %c0_17, %c0_18], %39 {strides = array<i32>} : memref<1x3x8x128xf32, #tpu.memory_space<vmem>>, vector<1x1x8x128xf32>,
      %c0_19 = arith.constant 0 : index
      %c1 = arith.constant 1 : index
      %c0_20 = arith.constant 0 : index
      %c0_21 = arith.constant 0 : index
      %40 = vector.load %arg4[%c0_19, %c1, %c0_20, %c0_21] : memref<1x3x8x128xf32, #tpu.memory_space<vmem>>, vector<1x1x8x128xf32>
      %41 = vector.shape_cast %40 : vector<1x1x8x128xf32> to vector<8x128xf32>
      %42 = arith.addf %41, %30 : vector<8x128xf32>
      %c0_22 = arith.constant 0 : index
      %c1_23 = arith.constant 1 : index
      %c0_24 = arith.constant 0 : index
      %c0_25 = arith.constant 0 : index
      %43 = vector.load %arg4[%c0_22, %c1_23, %c0_24, %c0_25] : memref<1x3x8x128xf32, #tpu.memory_space<vmem>>, vector<1x1x8x128xf32>
      %44 = vector.shape_cast %43 : vector<1x1x8x128xf32> to vector<8x128xf32>
      %45 = vector.shape_cast %42 : vector<8x128xf32> to vector<1x1x8x128xf32>
      tpu.vector_store %arg4[%c0_22, %c1_23, %c0_24, %c0_25], %45 {strides = array<i32>} : memref<1x3x8x128xf32, #tpu.memory_space<vmem>>, vector<1x1x8x128xf32>,
      %c0_26 = arith.constant 0 : index
      %c2 = arith.constant 2 : index
      %c0_27 = arith.constant 0 : index
      %c0_28 = arith.constant 0 : index
      %46 = vector.load %arg4[%c0_26, %c2, %c0_27, %c0_28] : memref<1x3x8x128xf32, #tpu.memory_space<vmem>>, vector<1x1x8x128xf32>
      %47 = vector.shape_cast %46 : vector<1x1x8x128xf32> to vector<8x128xf32>
      %48 = arith.addf %47, %33 : vector<8x128xf32>
      %c0_29 = arith.constant 0 : index
      %c2_30 = arith.constant 2 : index
      %c0_31 = arith.constant 0 : index
      %c0_32 = arith.constant 0 : index
      %49 = vector.load %arg4[%c0_29, %c2_30, %c0_31, %c0_32] : memref<1x3x8x128xf32, #tpu.memory_space<vmem>>, vector<1x1x8x128xf32>
      %50 = vector.shape_cast %49 : vector<1x1x8x128xf32> to vector<8x128xf32>
      %51 = vector.shape_cast %48 : vector<8x128xf32> to vector<1x1x8x128xf32>
      tpu.vector_store %arg4[%c0_29, %c2_30, %c0_31, %c0_32], %51 {strides = array<i32>} : memref<1x3x8x128xf32, #tpu.memory_space<vmem>>, vector<1x1x8x128xf32>,
    } else {
    }
    %11 = arith.extui %7 : i1 to i32
    %c0_i32_3 = arith.constant 0 : i32
    %12 = arith.cmpi ne, %11, %c0_i32_3 : i32
    scf.if %12 {
      %13 = tpu.iota {dimensions = array<i32: 0>} : vector<32x128xi32>
      %c128_i32 = arith.constant 128 : i32
      %14 = vector.broadcast %c128_i32 : i32 to vector<32x128xi32>
      %15 = arith.muli %13, %14 : vector<32x128xi32>
      %16 = tpu.iota {dimensions = array<i32: 1>} : vector<32x128xi32>
      %17 = arith.addi %15, %16 : vector<32x128xi32>
      %cst = arith.constant 0.000000e+00 : f32
      %18 = vector.broadcast %cst : f32 to vector<8x128xf32>
      %c0_i32_4 = arith.constant 0 : i32
      %c32_i32 = arith.constant 32 : i32
      %19 = arith.muli %c0_i32_4, %c32_i32 : i32
      %20 = arith.index_cast %19 : i32 to index
      %c0 = arith.constant 0 : index
      %21 = vector.load %arg2[%20, %c0] : memref<32x128xf32, #tpu.memory_space<vmem>>, vector<32x128xf32>
      %22 = arith.index_cast %19 : i32 to index
      %c0_5 = arith.constant 0 : index
      %23 = vector.load %arg3[%22, %c0_5] : memref<32x128xf32, #tpu.memory_space<vmem>>, vector<32x128xf32>
      %24 = arith.negf %21 : vector<32x128xf32>
      %25 = math.exp %24 : vector<32x128xf32>
      %cst_6 = arith.constant 1.000000e+00 : f32
      %26 = vector.broadcast %cst_6 : f32 to vector<32x128xf32>
      %27 = arith.addf %26, %25 : vector<32x128xf32>
      %28 = arith.divf %26, %27 : vector<32x128xf32>
      %c128_i32_7 = arith.constant 128 : i32
      %29 = arith.muli %19, %c128_i32_7 : i32
      %30 = arith.addi %2, %29 : i32
      %31 = vector.broadcast %30 : i32 to vector<32x128xi32>
      %32 = arith.addi %31, %17 : vector<32x128xi32>
      %c2048_i32_8 = arith.constant 2048 : i32
      %33 = vector.broadcast %c2048_i32_8 : i32 to vector<32x128xi32>
      %34 = arith.cmpi slt, %32, %33 : vector<32x128xi32>
      %cst_9 = arith.constant 0.000000e+00 : f32
      %35 = vector.broadcast %cst_9 : f32 to vector<32x128xf32>
      %36 = arith.select %34, %28, %35 : vector<32x128xi1>, vector<32x128xf32>
      %cst_10 = arith.constant 0.000000e+00 : f32
      %37 = vector.broadcast %cst_10 : f32 to vector<32x128xf32>
      %38 = arith.select %34, %23, %37 : vector<32x128xi1>, vector<32x128xf32>
      %39 = arith.mulf %36, %38 : vector<32x128xf32>
      %40 = vector.shape_cast %39 : vector<32x128xf32> to vector<4x8x128xf32>
      %cst_11 = arith.constant dense<0.000000e+00> : vector<8x128xf32>
      %41 = vector.multi_reduction <add>, %40, %cst_11 [0] : vector<4x8x128xf32> to vector<8x128xf32>
      %42 = arith.addf %18, %41 : vector<8x128xf32>
      %43 = vector.shape_cast %36 : vector<32x128xf32> to vector<4x8x128xf32>
      %cst_12 = arith.constant dense<0.000000e+00> : vector<8x128xf32>
      %44 = vector.multi_reduction <add>, %43, %cst_12 [0] : vector<4x8x128xf32> to vector<8x128xf32>
      %45 = arith.addf %18, %44 : vector<8x128xf32>
      %46 = vector.shape_cast %38 : vector<32x128xf32> to vector<4x8x128xf32>
      %cst_13 = arith.constant dense<0.000000e+00> : vector<8x128xf32>
      %47 = vector.multi_reduction <add>, %46, %cst_13 [0] : vector<4x8x128xf32> to vector<8x128xf32>
      %48 = arith.addf %18, %47 : vector<8x128xf32>
      %c1_i32_14 = arith.constant 1 : i32
      %c0_15 = arith.constant 0 : index
      %c0_16 = arith.constant 0 : index
      %c0_17 = arith.constant 0 : index
      %c0_18 = arith.constant 0 : index
      %49 = vector.load %arg4[%c0_15, %c0_16, %c0_17, %c0_18] : memref<1x3x8x128xf32, #tpu.memory_space<vmem>>, vector<1x1x8x128xf32>
      %50 = vector.shape_cast %49 : vector<1x1x8x128xf32> to vector<8x128xf32>
      %51 = arith.addf %50, %42 : vector<8x128xf32>
      %c0_19 = arith.constant 0 : index
      %c0_20 = arith.constant 0 : index
      %c0_21 = arith.constant 0 : index
      %c0_22 = arith.constant 0 : index
      %52 = vector.load %arg4[%c0_19, %c0_20, %c0_21, %c0_22] : memref<1x3x8x128xf32, #tpu.memory_space<vmem>>, vector<1x1x8x128xf32>
      %53 = vector.shape_cast %52 : vector<1x1x8x128xf32> to vector<8x128xf32>
      %54 = vector.shape_cast %51 : vector<8x128xf32> to vector<1x1x8x128xf32>
      tpu.vector_store %arg4[%c0_19, %c0_20, %c0_21, %c0_22], %54 {strides = array<i32>} : memref<1x3x8x128xf32, #tpu.memory_space<vmem>>, vector<1x1x8x128xf32>,
      %c0_23 = arith.constant 0 : index
      %c1 = arith.constant 1 : index
      %c0_24 = arith.constant 0 : index
      %c0_25 = arith.constant 0 : index
      %55 = vector.load %arg4[%c0_23, %c1, %c0_24, %c0_25] : memref<1x3x8x128xf32, #tpu.memory_space<vmem>>, vector<1x1x8x128xf32>
      %56 = vector.shape_cast %55 : vector<1x1x8x128xf32> to vector<8x128xf32>
      %57 = arith.addf %56, %45 : vector<8x128xf32>
      %c0_26 = arith.constant 0 : index
      %c1_27 = arith.constant 1 : index
      %c0_28 = arith.constant 0 : index
      %c0_29 = arith.constant 0 : index
      %58 = vector.load %arg4[%c0_26, %c1_27, %c0_28, %c0_29] : memref<1x3x8x128xf32, #tpu.memory_space<vmem>>, vector<1x1x8x128xf32>
      %59 = vector.shape_cast %58 : vector<1x1x8x128xf32> to vector<8x128xf32>
      %60 = vector.shape_cast %57 : vector<8x128xf32> to vector<1x1x8x128xf32>
      tpu.vector_store %arg4[%c0_26, %c1_27, %c0_28, %c0_29], %60 {strides = array<i32>} : memref<1x3x8x128xf32, #tpu.memory_space<vmem>>, vector<1x1x8x128xf32>,
      %c0_30 = arith.constant 0 : index
      %c2 = arith.constant 2 : index
      %c0_31 = arith.constant 0 : index
      %c0_32 = arith.constant 0 : index
      %61 = vector.load %arg4[%c0_30, %c2, %c0_31, %c0_32] : memref<1x3x8x128xf32, #tpu.memory_space<vmem>>, vector<1x1x8x128xf32>
      %62 = vector.shape_cast %61 : vector<1x1x8x128xf32> to vector<8x128xf32>
      %63 = arith.addf %62, %48 : vector<8x128xf32>
      %c0_33 = arith.constant 0 : index
      %c2_34 = arith.constant 2 : index
      %c0_35 = arith.constant 0 : index
      %c0_36 = arith.constant 0 : index
      %64 = vector.load %arg4[%c0_33, %c2_34, %c0_35, %c0_36] : memref<1x3x8x128xf32, #tpu.memory_space<vmem>>, vector<1x1x8x128xf32>
      %65 = vector.shape_cast %64 : vector<1x1x8x128xf32> to vector<8x128xf32>
      %66 = vector.shape_cast %63 : vector<8x128xf32> to vector<1x1x8x128xf32>
      tpu.vector_store %arg4[%c0_33, %c2_34, %c0_35, %c0_36], %66 {strides = array<i32>} : memref<1x3x8x128xf32, #tpu.memory_space<vmem>>, vector<1x1x8x128xf32>,
    } else {
    }
    return
  }
  func.func @transform_0(%arg0: i32, %arg1: i32) -> (i32, i32) {
    %c1_i32 = arith.constant 1 : i32
    %0 = arith.muli %arg0, %c1_i32 : i32
    %1 = arith.addi %0, %arg1 : i32
    %c0_i32 = arith.constant 0 : i32
    %2 = arith.minsi %1, %c0_i32 : i32
    %c0_i32_0 = arith.constant 0 : i32
    %c0_i32_1 = arith.constant 0 : i32
    return %2, %c0_i32_0 : i32, i32
  }
  func.func @transform_1(%arg0: i32, %arg1: i32) -> (i32, i32) {
    %c1_i32 = arith.constant 1 : i32
    %0 = arith.muli %arg0, %c1_i32 : i32
    %1 = arith.addi %0, %arg1 : i32
    %c0_i32 = arith.constant 0 : i32
    %2 = arith.minsi %1, %c0_i32 : i32
    %c0_i32_0 = arith.constant 0 : i32
    %c0_i32_1 = arith.constant 0 : i32
    return %2, %c0_i32_0 : i32, i32
  }
  func.func @transform_2(%arg0: i32, %arg1: i32) -> (i32, i32, i32, i32) {
    %c0_i32 = arith.constant 0 : i32
    %c0_i32_0 = arith.constant 0 : i32
    %c0_i32_1 = arith.constant 0 : i32
    %c0_i32_2 = arith.constant 0 : i32
    return %arg0, %c0_i32, %c0_i32_0, %c0_i32_1 : i32, i32, i32, i32
  }
}

</mosaic_0001>

<bundles_post_ra>
// kernel: soft_dice_loss.1
= control target key start
LH: loop header
LB: loop body
LE: loop exit
PB: predicated region body
PF: predicated region fallthrough
CT: control target
= control target key end

     0   :  { %v224_v0 = vlaneseq  ;;  %s542_s0 = inlined_call_operand.vmem [shape: f32[16,128], index: 0, kind: input, shape index: {}]   ;;  %s543_s1 = inlined_call_operand.vmem [shape: f32[16,128], index: 1, kind: input, shape index: {}]   ;;  %s544_s2 = inlined_call_operand.vmem [shape: f32[1,3,8,128], index: 2, kind: output, shape index: {}]  }
   0x1   :  { %v239_v1 = vld [vmem:[%s542_s0] sm:$0xff]  ;;  %v240_v2 = vld [vmem:[%s542_s0 + $0x8] sm:$0xff]  ;;  %v241_v5 = vld [vmem:[%s542_s0 + $0x10] sm:$0xff] }
   0x2   :  { %v225_v3 = vshrl.u32 %v224_v0, 7  ;;  %v234_v4 = vand.u32 127, %v224_v0  ;;  %v242_v6 = vld [vmem:[%s542_s0 + $0x18] sm:$0xff]  ;;  %v391_v7 = vmul.f32 -1.442695, %v239_v1  ;;  %v243_v21 = vld [vmem:[%s543_s1] sm:$0xff] }
   0x3   :  { %v392_v8 = vmul.f32 -1.442695, %v240_v2  ;;  %v393_v13 = vmul.f32 -1.442695, %v241_v5  ;;  %v394_v14 = vmul.f32 -1.442695, %v242_v6 }
   0x4   :  { %v226_v9 = vadd.s32 8, %v225_v3  ;;  %v227_v10 = vadd.s32 16, %v225_v3  ;;  %v228_v11 = vadd.s32 24, %v225_v3  ;;  %v229_v12 = vmul.u32 128, %v225_v3  ;;  %v244_v22 = vld [vmem:[%s543_s1 + $0x8] sm:$0xff]  ;;  %v245_v27 = vld [vmem:[%s543_s1 + $0x10] sm:$0xff] }
   0x5   :  { %400 = vpow2.f32 %v391_v7  ;;  %v246_v36 = vld [vmem:[%s543_s1 + $0x18] sm:$0xff] }
   0x6   :  { %v230_v15 = vmul.u32 128, %v226_v9  ;;  %v231_v16 = vmul.u32 128, %v227_v10  ;;  %v443_v17 = vadd.s32 %v234_v4, %v229_v12  ;;  %402 = vpow2.f32 %v392_v8 }
   0x7   :  { %v232_v18 = vmul.u32 128, %v228_v11  ;;  %404 = vpow2.f32 %v393_v13 }
   0x8   :  { %v445_v19 = vadd.s32 %v234_v4, %v230_v15  ;;  %v447_v20 = vadd.s32 %v234_v4, %v231_v16  ;;  %406 = vpow2.f32 %v394_v14  ;;  %vm328_vm0 = vcmp.lt.s32.totalorder %v443_v17, 2048 }
   0x9   :  { %v459_v24 = vsel %vm328_vm0, %v243_v21, 0.0  ;;  %v465_v26 = vadd.s32 %v234_v4, %v232_v18 }
   0xa   :  { %vm329_vm1 = vcmp.lt.s32.totalorder %v445_v19, 2048  ;;  %vm330_vm2 = vcmp.lt.s32.totalorder %v447_v20, 2048 }
   0xb   :  { %v401_v23 = vpop.eup %400  ;;  %v463_v25 = vsel %vm329_vm1, %v244_v22, 0.0  ;;  %v475_v35 = vsel %vm330_vm2, %v245_v27, 0.0  ;;  %vm331_vm3 = vcmp.lt.s32.totalorder %v465_v26, 2048 }
   0xc   :  { %v259_v28 = vadd.f32 1.0, %v401_v23  ;;  %v352_v29 = vadd.f32 %v463_v25, %v459_v24  ;;  %v403_v30 = vpop.eup %402  ;;  %v484_v41 = vsel %vm331_vm3, %v246_v36, 0.0 }
   0xd   :  { %v405_v31 = vpop.eup %404  ;;  %v260_v32 = vadd.f32 1.0, %v403_v30 }
   0xe   :  { %408 = vrcp.f32 %v259_v28  ;;  %v407_v33 = vpop.eup %406  ;;  %v261_v34 = vadd.f32 1.0, %v405_v31  ;;  %v353_v38 = vadd.f32 %v352_v29, %v475_v35  ;;  %v272_v39 = vand.u32 2147483647, %v259_v28 }
   0xf   :  { %v262_v37 = vadd.f32 1.0, %v407_v33  ;;  %410 = vrcp.f32 %v260_v32  ;;  %v274_v40 = vand.u32 2147483648, %v259_v28  ;;  %vm268_vm4 = vweird.f32 %v259_v28 }
  0x10   :  { %412 = vrcp.f32 %v261_v34  ;;  %v354_v43 = vadd.f32 %v353_v38, %v484_v41  ;;  %vm487_vm5 = vcmp.eq.f32.partialorder %v272_v39, 8.507059e+37  ;;  %vm283_vm6 = vweird.f32 %v260_v32 }
  0x11   :  { %414 = vrcp.f32 %v262_v37  ;;  %v275_v47 = vor.u32 1.1754944e-38, %v274_v40  ;;  %v287_v48 = vand.u32 2147483647, %v260_v32  ;;  %v289_v49 = vand.u32 2147483648, %v260_v32 }
  0x12   :  { %vm298_vm8 = vweird.f32 %v261_v34  ;;  %v302_v55 = vand.u32 2147483647, %v261_v34  ;;  %v304_v56 = vand.u32 2147483648, %v261_v34  ;;  %vm313_vm9 = vweird.f32 %v262_v37  ;;  %398 = vst [vmem:[%s544_s2 + $0x10] sm:$0xff] %v354_v43 }
  0x13   :  { %v317_v62 = vand.u32 2147483647, %v262_v37  ;;  %v319_v63 = vand.u32 2147483648, %v262_v37  ;;  %vm504_vm15 = vcmp.eq.f32.partialorder %v287_v48, 8.507059e+37  ;;  %v290_v5 = vor.u32 1.1754944e-38, %v289_v49 }
  0x14   :  { %v409_v42 = vpop.eup %408  ;;  %v305_v10 = vor.u32 1.1754944e-38, %v304_v56 }
  0x15   :  { %v264_v44 = vmul.f32 %v409_v42, %v259_v28  ;;  %v411_v46 = vpop.eup %410  ;;  %vm269_vm7 = vweird.f32 %v409_v42  ;;  %v320_v14 = vor.u32 1.1754944e-38, %v319_v63 }
  0x16   :  { %v413_v50 = vpop.eup %412  ;;  %v279_v52 = vmul.f32 %v411_v46, %v260_v32  ;;  %vm284_vm10 = vweird.f32 %v411_v46  ;;  %vm495_vm11 = vmor %vm268_vm4, %vm269_vm7 }
  0x17   :  { %v265_v51 = vsub.f32 1.0, %v264_v44  ;;  %v415_v53 = vpop.eup %414  ;;  %v294_v54 = vmul.f32 %v413_v50, %v261_v34  ;;  %vm299_vm12 = vweird.f32 %v413_v50  ;;  %vm500_vm14 = vmor %vm283_vm6, %vm284_vm10  ;;  %vm303_vm6 = vcmp.eq.f32.partialorder %v302_v55, 8.507059e+37 }
  0x18   :  { %v280_v58 = vsub.f32 1.0, %v279_v52  ;;  %v309_v59 = vmul.f32 %v415_v53, %v262_v37  ;;  %vm314_vm13 = vweird.f32 %v415_v53  ;;  %vm511_vm4 = vmor %vm298_vm8, %vm299_vm12  ;;  %vm318_vm10 = vcmp.eq.f32.partialorder %v317_v62, 8.507059e+37 }
  0x19   :  { %v266_v57 = vmul.f32 %v409_v42, %v265_v51  ;;  %v295_v61 = vsub.f32 1.0, %v294_v54  ;;  %vm315_vm7 = vmor %vm313_vm9, %vm314_vm13 }
  0x1a   :  { %v281_v1 = vmul.f32 %v411_v46, %v280_v58  ;;  %v310_v2 = vsub.f32 1.0, %v309_v59 }
  0x1b   :  { %v267_v0 = vadd.f32 %v409_v42, %v266_v57  ;;  %v296_v6 = vmul.f32 %v413_v50, %v295_v61 }
  0x1c   :  { %v282_v8 = vadd.f32 %v411_v46, %v281_v1  ;;  %v311_v11 = vmul.f32 %v415_v53, %v310_v2 }
  0x1d   :  { %v271_v7 = vsel %vm495_vm11, %v409_v42, %v267_v0  ;;  %v297_v13 = vadd.f32 %v413_v50, %v296_v6 }
  0x1e   :  { %v276_v12 = vsel %vm487_vm5, %v275_v47, %v271_v7  ;;  %v286_v15 = vsel %vm500_vm14, %v411_v46, %v282_v8  ;;  %v312_v16 = vadd.f32 %v415_v53, %v311_v11 }
  0x1f   :  { %v332_v18 = vsel %vm328_vm0, %v276_v12, 0.0  ;;  %v291_v21 = vsel %vm504_vm15, %v290_v5, %v286_v15  ;;  %v301_v22 = vsel %vm511_vm4, %v413_v50, %v297_v13 }
  0x20   :  { %v340_v23 = vmul.f32 %v459_v24, %v332_v18  ;;  %v306_v27 = vsel %vm303_vm6, %v305_v10, %v301_v22  ;;  %v316_v28 = vsel %vm315_vm7, %v415_v53, %v312_v16  ;;  %v333_v29 = vsel %vm329_vm1, %v291_v21, 0.0 }
  0x21   :  { %v321_v30 = vsel %vm318_vm10, %v320_v14, %v316_v28  ;;  %v334_v31 = vsel %vm330_vm2, %v306_v27, 0.0  ;;  %v341_v17 = vmul.f32 %v463_v25, %v333_v29  ;;  %v348_v32 = vadd.f32 %v333_v29, %v332_v18 }
  0x22   :  { %v335_v33 = vsel %vm331_vm3, %v321_v30, 0.0  ;;  %v342_v34 = vmul.f32 %v475_v35, %v334_v31 }
  0x23   :  { %v343_v36 = vmul.f32 %v484_v41, %v335_v33  ;;  %v344_v24 = vadd.f32 %v341_v17, %v340_v23  ;;  %v349_v37 = vadd.f32 %v348_v32, %v334_v31 }
  0x25   :  { %v345_v38 = vadd.f32 %v344_v24, %v342_v34  ;;  %v350_v39 = vadd.f32 %v349_v37, %v335_v33 }
  0x27   :  { %v346_v19 = vadd.f32 %v345_v38, %v343_v36  ;;  %396 = vst [vmem:[%s544_s2 + $0x8] sm:$0xff] %v350_v39 }
  0x29   :  { %358 = vst [vmem:[%s544_s2] sm:$0xff] %v346_v19 }

</bundles_post_ra>
